<compile_context>
chip_gen: v7x
topology: tpu7x:2x2x1
jax: 0.10.0
libtpu: 0.0.40
codegen_flags: <defaults>
</compile_context>

<pallas_src>
import jax
import jax.numpy as jnp
from jax.experimental import pallas as pl
from jax.experimental.pallas import tpu as pltpu

_LANE = 128
_LANE_CANDIDATES = (2048, 1024, 512, 256, 128)   # widest lane-dense last dim first
_TARGET_TILE_BYTES = 4 * 1024 * 1024             # ~4 MiB per tile per ref
_VMEM_LIMIT_BYTES = 32 * 1024 * 1024             # uniform scoped VMEM limit (helps v5e)


def _dot_fusion_kernel(x1_ref, x2_ref, o_ref):
    # Elementwise product of the current VMEM tiles (pure VPU work).
    o_ref[...] = x1_ref[...] * x2_ref[...]


def _sublane_pack(dtype) -> int:
    """Native packed sublane count per vreg for this dtype (8/16/32)."""
    itemsize = jnp.dtype(dtype).itemsize
    return max(8, 8 * (4 // itemsize))   # f32 -> 8, bf16 -> 16, int8/fp8 -> 32


def _run_2d(x1_2d: jax.Array, x2_2d: jax.Array) -> jax.Array:
    """Run the Pallas kernel on a lane-dense (rows, lanes) slab."""
    rows, lanes = x1_2d.shape
    itemsize = jnp.dtype(x1_2d.dtype).itemsize
    pack = _sublane_pack(x1_2d.dtype)

    # Biggest row-block that fits the per-tile VMEM budget, aligned to the
    # dtype's sublane packing (or the full row extent, which is always legal).
    max_rows = max(1, _TARGET_TILE_BYTES // (lanes * itemsize))
    if rows <= max_rows:
        block_rows = rows
    else:
        block_rows = max(pack, (max_rows // pack) * pack)

    grid = (pl.cdiv(rows, block_rows),)
    spec = pl.BlockSpec((block_rows, lanes), lambda i: (i, 0))

    return pl.pallas_call(
        _dot_fusion_kernel,
        out_shape=jax.ShapeDtypeStruct((rows, lanes), x1_2d.dtype),
        grid=grid,
        in_specs=[spec, spec],
        out_specs=spec,
        compiler_params=pltpu.CompilerParams(
            dimension_semantics=("parallel",),
            vmem_limit_bytes=_VMEM_LIMIT_BYTES,
        ),
    )(x1_2d, x2_2d)


def dot_fusion(x1: jax.Array, x2: jax.Array) -> jax.Array:
    """Elementwise multiply x1 * x2 via a Pallas TPU kernel.

    x1, x2 must have identical shapes/dtypes (matches the module's usage).
    """
    assert x1.shape == x2.shape, "DotFusion expects same-shape inputs"
    assert x1.dtype == x2.dtype, "DotFusion expects same-dtype inputs"

    orig_shape = x1.shape
    n = x1.size
    if n == 0:
        return x1 * x2

    if n % _LANE == 0:
        # Fast path: pure reshape to a lane-dense slab, no padding / extra copies.
        lanes = next(c for c in _LANE_CANDIDATES if n % c == 0)
        rows = n // lanes
        out = _run_2d(x1.reshape(rows, lanes), x2.reshape(rows, lanes))
        return out.reshape(orig_shape)

    # Ragged fallback: flatten + pad the tail to a full 512-lane row.
    lanes = 512
    n_pad = pl.cdiv(n, lanes) * lanes
    x1f = jnp.pad(x1.reshape(-1), (0, n_pad - n))
    x2f = jnp.pad(x2.reshape(-1), (0, n_pad - n))
    rows = n_pad // lanes
    out = _run_2d(x1f.reshape(rows, lanes), x2f.reshape(rows, lanes))
    return out.reshape(-1)[:n].reshape(orig_shape)


if __name__ == "__main__":
    key = jax.random.PRNGKey(0)
    k1, k2 = jax.random.split(key)

    # NCHW inputs consistent with a conv-feature fusion use case.
    shape = (2, 4, 16, 16)
    x1 = jax.random.normal(k1, shape, dtype=jnp.float32)
    x2 = jax.random.normal(k2, shape, dtype=jnp.float32)

    out = dot_fusion(x1, x2)
    jax.block_until_ready(out)

    ref = x1 * x2
    assert out.shape == ref.shape
    assert jnp.allclose(out, ref, atol=1e-6, rtol=1e-6)

    # Also exercise the ragged fallback path (size not a multiple of 128).
    shape_r = (3, 5, 7)
    y1 = jax.random.normal(k1, shape_r, dtype=jnp.float32)
    y2 = jax.random.normal(k2, shape_r, dtype=jnp.float32)
    out_r = dot_fusion(y1, y2)
    jax.block_until_ready(out_r)
    assert jnp.allclose(out_r, y1 * y2, atol=1e-6, rtol=1e-6)

    print("KERNEL_OK")
</pallas_src>

<mosaic_0001>
module attributes {stable_mosaic.version = 11 : i64} {
  func.func @_dot_fusion_kernel(%arg0: i32, %arg1: memref<1x2048xf32, #tpu.memory_space<vmem>>, %arg2: memref<1x2048xf32, #tpu.memory_space<vmem>>, %arg3: memref<1x2048xf32, #tpu.memory_space<vmem>>) attributes {dimension_semantics = [#tpu.dimension_semantics<parallel>], iteration_bounds = array<i64: 1>, scalar_prefetch = 0 : i64, scratch_operands = 0 : i64, tpu.core_type = #tpu.core_type<tc>, window_params = [{transform_indices = @transform_0, window_bounds = array<i64: 1, 2048>}, {transform_indices = @transform_1, window_bounds = array<i64: 1, 2048>}, {transform_indices = @transform_2, window_bounds = array<i64: 1, 2048>}]} {
    %c0 = arith.constant 0 : index
    %c0_0 = arith.constant 0 : index
    %0 = vector.load %arg1[%c0, %c0_0] : memref<1x2048xf32, #tpu.memory_space<vmem>>, vector<1x2048xf32>
    %c0_1 = arith.constant 0 : index
    %c0_2 = arith.constant 0 : index
    %1 = vector.load %arg2[%c0_1, %c0_2] : memref<1x2048xf32, #tpu.memory_space<vmem>>, vector<1x2048xf32>
    %2 = arith.mulf %0, %1 : vector<1x2048xf32>
    %c0_3 = arith.constant 0 : index
    %c0_4 = arith.constant 0 : index
    %3 = vector.load %arg3[%c0_3, %c0_4] : memref<1x2048xf32, #tpu.memory_space<vmem>>, vector<1x2048xf32>
    tpu.vector_store %arg3[%c0_3, %c0_4], %2 {strides = array<i32>} : memref<1x2048xf32, #tpu.memory_space<vmem>>, vector<1x2048xf32>,
    return
  }
  func.func @transform_0(%arg0: i32) -> (i32, i32) {
    %c0_i32 = arith.constant 0 : i32
    %c0_i32_0 = arith.constant 0 : i32
    return %arg0, %c0_i32 : i32, i32
  }
  func.func @transform_1(%arg0: i32) -> (i32, i32) {
    %c0_i32 = arith.constant 0 : i32
    %c0_i32_0 = arith.constant 0 : i32
    return %arg0, %c0_i32 : i32, i32
  }
  func.func @transform_2(%arg0: i32) -> (i32, i32) {
    %c0_i32 = arith.constant 0 : i32
    %c0_i32_0 = arith.constant 0 : i32
    return %arg0, %c0_i32 : i32, i32
  }
}

</mosaic_0001>

<bundles_post_ra>
// kernel: tpu_custom_call.1
= control target key start
LH: loop header
LB: loop body
LE: loop exit
PB: predicated region body
PF: predicated region fallthrough
CT: control target
= control target key end

     0   :  { %7 = vsyncpa [#allocation3], 0  ;;  %s189_s0 = inlined_call_operand.hbm [shape: f32[1,2048], index: 0, kind: input, shape index: {}]   ;;  %s190_s1 = inlined_call_operand.hbm [shape: f32[1,2048], index: 1, kind: input, shape index: {}]   ;;  %s191_s2 = inlined_call_operand.hbm [shape: f32[1,2048], index: 2, kind: output, shape index: {}]  }
   0x1   :  { %8 = vsyncpa [#allocation6], 0 }
   0x2   :  { %9 = vsyncpa [#allocation4], 0  ;;  %s135_s9 = smov [#allocation2]   ;;  %s136_s11 = smov [#allocation5]  }
   0x3   :  { %s16_s10 = sshll.u32 %s135_s9, 4  ;;  %s26_s12 = sshll.u32 %s136_s11, 4  ;;  %s17_s10 = int_to_ptr.vmem [resolvable:$true] %s16_s10  ;;  %s27_s12 = int_to_ptr.vmem [resolvable:$true] %s26_s12 }
   0x4   :  { %s63_s15 = scalar_lea.hbm %s189_s0, 256 }
   0x5   :  { %p64_p0 = scmp.ne.s32.totalorder %s189_s0, %s63_s15  ;;  %p67_p1 = scmp.lt.u32.totalorder %s63_s15, %s189_s0 }
   0x7   :  { %p69_p2 = pnand %p67_p1, %p64_p0 }
   0x9   :  { %72 = shalt.err (!%p69_p2)
}
   0xa   :  { %s73_s20 = scalar_lea.vmem %s17_s10, 256  ;;  %p78_p4 = scmp.lt.s32.totalorder %s17_s10, %s17_s10 }
   0xb   :  { %p74_p3 = scmp.ne.s32.totalorder %s17_s10, %s73_s20  ;;  %p79_p5 = scmp.lt.s32.totalorder %s73_s20, %s73_s20 }
   0xd   :  { %p80_p6 = por %p79_p5, %p78_p4 }
   0xf   :  { %p81_p7 = pnand %p80_p6, %p74_p3 }
  0x11   :  { %84 = shalt.err (!%p81_p7)
}
  0x12   :  { %19 = dma.hbm_to_vmem [thread:$0]  %s189_s0, 256, %s17_s10, [#allocation3]  }
  0x13   :  { %s85_s25 = scalar_lea.hbm %s190_s1, 256 }
  0x14   :  { %p86_p8 = scmp.ne.s32.totalorder %s190_s1, %s85_s25  ;;  %p89_p9 = scmp.lt.u32.totalorder %s85_s25, %s190_s1 }
  0x16   :  { %p91_p10 = pnand %p89_p9, %p86_p8 }
  0x18   :  { %94 = shalt.err (!%p91_p10)
}
  0x19   :  { %s95_s30 = scalar_lea.vmem %s27_s12, 256  ;;  %p100_p12 = scmp.lt.s32.totalorder %s27_s12, %s27_s12 }
  0x1a   :  { %p96_p11 = scmp.ne.s32.totalorder %s27_s12, %s95_s30  ;;  %p101_p13 = scmp.lt.s32.totalorder %s95_s30, %s95_s30 }
  0x1c   :  { %p102_p0 = por %p101_p13, %p100_p12 }
  0x1e   :  { %p103_p1 = pnand %p102_p0, %p96_p11 }
  0x20   :  { %106 = shalt.err (!%p103_p1)
}
  0x21   :  { %29 = dma.hbm_to_vmem [thread:$0]  %s190_s1, 256, %s27_s12, [#allocation6]  }
  0x22   :  { %129 = dma.done.wait [#allocation3], 256  }
  0x23   :  { %130 = vsyncadd [#allocation3], 4294967040 }
  0x24   :  { %131 = dma.done.wait [#allocation6], 256  }
  0x25   :  { %132 = vsyncadd [#allocation6], 4294967040  ;;  %s137_s4 = smov [#allocation7]   ;;  %v36_v0 = vld [vmem:[#allocation2] sm:$0xff]  ;;  %v38_v1 = vld [vmem:[#allocation5] sm:$0xff] }
  0x26   :  { %s50_s5 = sshll.u32 %s137_s4, 4  ;;  %v37_v2 = vld [vmem:[#allocation2 + $0x8] sm:$0xff]  ;;  %v40_v3 = vmul.f32 %v38_v1, %v36_v0  ;;  %v39_v4 = vld [vmem:[#allocation5 + $0x8] sm:$0xff]  ;;  %s51_s5 = int_to_ptr.vmem [resolvable:$true] %s50_s5 }
  0x27   :  { %v41_v5 = vmul.f32 %v39_v4, %v37_v2  ;;  %s107_s6 = scalar_lea.vmem %s51_s5, 256  ;;  %p112_p3 = scmp.lt.s32.totalorder %s51_s5, %s51_s5 }
  0x28   :  { %42 = vst [vmem:[#allocation7] sm:$0xff] %v40_v3  ;;  %p108_p2 = scmp.ne.s32.totalorder %s51_s5, %s107_s6  ;;  %p113_p4 = scmp.lt.s32.totalorder %s107_s6, %s107_s6 }
  0x29   :  { %43 = vst [vmem:[#allocation7 + $0x8] sm:$0xff] %v41_v5 }
  0x2a   :  { %p114_p5 = por %p113_p4, %p112_p3 }
  0x2c   :  { %p115_p6 = pnand %p114_p5, %p108_p2 }
  0x2e   :  { %118 = shalt.err (!%p115_p6)
}
  0x2f   :  { %s119_s8 = scalar_lea.hbm %s191_s2, 256 }
  0x30   :  { %p120_p7 = scmp.ne.s32.totalorder %s191_s2, %s119_s8  ;;  %p123_p8 = scmp.lt.u32.totalorder %s119_s8, %s191_s2 }
  0x32   :  { %p125_p9 = pnand %p123_p8, %p120_p7 }
  0x34   :  { %128 = shalt.err (!%p125_p9)
}
  0x35   :  { %53 = dma.vmem_to_hbm [thread:$0]  %s51_s5, 256, %s191_s2, [#allocation4]  }
  0x36   :  { %133 = dma.done.wait [#allocation4], 256  }
  0x37   :  { %134 = vsyncadd [#allocation4], 4294967040 }
  0x38   :  { %57 = vsyncpa [#allocation3], 1 }
  0x39   :  { %58 = vsyncpa [#allocation6], 1 }
  0x3a   :  { %59 = vsyncpa [#allocation4], 1 }

</bundles_post_ra>
